<compile_context>
chip_gen: v7x
topology: tpu7x:2x2x1
jax: 0.10.0
libtpu: 0.0.40
codegen_flags: <defaults>
</compile_context>

<pallas_src>
import functools
from typing import NamedTuple

import jax
import jax.numpy as jnp
from jax.experimental import pallas as pl
from jax.experimental.pallas import tpu as pltpu


def _round_up(value, multiple):
    return -(-value // multiple) * multiple


def _lane_group(embedding_dim):
    """How many sites are packed into one 128-lane output row."""
    return max(1, 128 // embedding_dim)


class PackedEmbedding(NamedTuple):
    """Pre-packed parameter storage (init-time; keeps the hot path transpose-free)."""
    table: jax.Array     # (P, Npad//g, g*E): one lane-dense plane per physical value
    L1: int
    L2: int
    orbit: int
    P: int
    E: int
    g: int
    N: int
    Npad: int


def pack_embedding_param(param):
    """[L1, L2, orbit, P, E] -> lane-packed (P, Npad//g, g*E) table.

    Done ONCE when the parameter is created/updated (this is the stored format of
    the parameter); the per-call forward contains no full-table transpose.
    """
    L1, L2, orbit, P, E = (int(d) for d in param.shape)
    N = L1 * L2 * orbit
    g = _lane_group(E)
    Npad = _round_up(N, 8 * g)              # keeps (8,128)-legal tiles for any N
    p = param.reshape(N, P, E)
    if Npad != N:
        p = jnp.pad(p, ((0, Npad - N), (0, 0), (0, 0)))
    # (Npad, P, E) -> (Npad//g, g, P, E) -> (P, Npad//g, g, E) -> (P, Npad//g, g*E)
    packed = (p.reshape(Npad // g, g, P, E)
                .transpose(2, 0, 1, 3)
                .reshape(P, Npad // g, g * E))
    return PackedEmbedding(packed, L1, L2, orbit, P, E, g, N, Npad)


def _embedding_kernel(x_ref, p_ref, o_ref, *, phys, group, emb):
    # x_ref: (g, tb, tm, 1) int32  -- per-slot physical indices for this tile
    # p_ref: (P, tm, g*E) float32  -- lane-packed param planes, one per physical value
    # o_ref: (tb, tm, g*E)
    out_shape = o_ref.shape

    # Expand the per-slot indices across their E-lane groups ONCE (hoisted out of
    # the select loop; avoids re-broadcasting the index per physical value).
    if group == 1:
        idx_exp = jnp.broadcast_to(x_ref[0], out_shape)
    else:
        lane = jax.lax.broadcasted_iota(jnp.int32, out_shape, len(out_shape) - 1)
        idx_exp = jnp.zeros(out_shape, jnp.int32)
        for slot in range(group):
            in_slot = (lane >= slot * emb) & (lane < (slot + 1) * emb)
            idx_exp = jnp.where(in_slot, x_ref[slot], idx_exp)

    # Gather == P-way where-chain (pure VPU work, hidden under the DMA streams).
    # Out-of-range indices produce zero rows (acc starts at zero).
    acc = jnp.zeros(out_shape, o_ref.dtype)
    for p in range(phys):
        acc = jnp.where(idx_exp == p, p_ref[p][None], acc)
    o_ref[...] = acc


def _vmem_budget_bytes():
    """(working-set budget, vmem_limit_bytes), generation-aware."""
    vmem = None
    try:
        vmem = getattr(pltpu.get_tpu_info(), "vmem_capacity_bytes", None)
    except Exception:
        vmem = None
    if vmem is not None and vmem >= 100 * (1 << 20):
        # v5e / v6e: 128 MiB VMEM -> bigger tiles amortize the ~0.35 us step overhead
        return 48 * (1 << 20), 64 * (1 << 20)
    # v7x (64 MiB / TensorCore) or unknown: smaller budget keeps double-buffering intact
    return 24 * (1 << 20), 48 * (1 << 20)


def _choose_tiles(B, Ng, P, gE, g, budget_bytes):
    """Pick (site tile tm, batch tile tb) so each step moves ~MBs within the budget."""
    itemsize = 4
    site_tiles = [d for d in range(8, Ng + 1, 8) if Ng % d == 0]  # Ng is a multiple of 8

    def working_set(tm, tb):
        param_b = 2 * P * tm * gE * itemsize         # double-buffered param slab
        out_b = 2 * tb * tm * gE * itemsize          # double-buffered output block
        idx_b = 2 * g * tb * tm * 128 * itemsize     # index block (1-lane dim pads to 128)
        return param_b + out_b + idx_b

    tm = site_tiles[0]
    for cand in sorted(site_tiles, reverse=True):
        if (2 * P * cand * gE * itemsize <= budget_bytes // 2
                and working_set(cand, 1) <= budget_bytes):
            tm = cand
            break

    tb = 1
    for cand in [d for d in range(1, B + 1) if B % d == 0]:
        if working_set(tm, cand) > budget_bytes:
            break
        tb = cand
        if cand * tm * gE * itemsize >= 2 * (1 << 20):   # ~2 MiB useful bytes / step
            break
    return tm, tb


def embedding_forward(x, packed, *, site_tile=None, batch_tile=None):
    """x: [B, L1, L2, orbit] int, packed: PackedEmbedding -> [B, L1*L2*orbit, E]."""
    B = x.shape[0]
    L1, L2, orbit = packed.L1, packed.L2, packed.orbit
    P, E, g, N, Npad = packed.P, packed.E, packed.g, packed.N, packed.Npad
    assert x.shape == (B, L1, L2, orbit)
    Ng = Npad // g
    gE = g * E

    # Hot-path index plumbing only (B*N ints; the E-times-larger table is untouched).
    xi = x.reshape(B, N).astype(jnp.int32)
    if Npad != N:
        xi = jnp.pad(xi, ((0, 0), (0, Npad - N)))
    # (B, Npad) -> (g, B, Ng, 1): slot-major so the kernel indexes only the leading dim.
    xg = xi.reshape(B, Ng, g).transpose(2, 0, 1)[..., None]

    budget, vmem_limit = _vmem_budget_bytes()
    tm, tb = _choose_tiles(B, Ng, P, gE, g, budget)
    if site_tile is not None:
        tm = site_tile
    if batch_tile is not None:
        tb = batch_tile
    assert Ng % tm == 0 and (tm % 8 == 0 or tm == Ng)
    assert B % tb == 0

    n_site_blocks = Ng // tm
    n_batch_blocks = B // tb
    # Batch innermost -> the (P, tm, gE) param slab stays VMEM-resident across it.
    grid = (n_site_blocks, n_batch_blocks)

    if n_site_blocks >= 2:
        dims = ("parallel", "arbitrary")
    elif n_batch_blocks >= 2:
        # Small-N configs: let megacore (v7x) shard the batch axis instead.
        dims = ("arbitrary", "parallel")
    else:
        dims = ("arbitrary", "arbitrary")

    out = pl.pallas_call(
        functools.partial(_embedding_kernel, phys=P, group=g, emb=E),
        out_shape=jax.ShapeDtypeStruct((B, Ng, gE), packed.table.dtype),
        grid_spec=pltpu.PrefetchScalarGridSpec(
            num_scalar_prefetch=0,
            grid=grid,
            in_specs=[
                # per-slot indices for this (site, batch) tile
                pl.BlockSpec((g, tb, tm, 1), lambda s, b: (0, b, s, 0)),
                # param slab for these tm site-groups; independent of b -> fetched
                # once per site block and kept resident across the inner batch loop.
                # TODO(synk): add pipeline_mode=pl.Buffered(3) here if profiling shows
                # the next slab's DMA exposed at site-block boundaries.
                pl.BlockSpec((P, tm, gE), lambda s, b: (0, s, 0)),
            ],
            out_specs=pl.BlockSpec((tb, tm, gE), lambda s, b: (b, s, 0)),
        ),
        compiler_params=pltpu.CompilerParams(
            dimension_semantics=dims,
            vmem_limit_bytes=vmem_limit,
        ),
    )(xg, packed.table)

    # Free reshape: packed lane (slot*E + e) is exactly site-major (site, e) order.
    out = out.reshape(B, Npad, E)
    if Npad != N:
        out = out[:, :N, :]
    return out


def _reference(x, param):
    # Plain-JAX reference of the PyTorch forward.
    B = x.shape[0]
    L1, L2, orbit, P, E = param.shape
    N = L1 * L2 * orbit
    p = param.reshape(N, P, E)
    xi = x.reshape(B, N)
    return p[jnp.arange(N)[None, :], xi, :]            # [B, N, E]


def _run_case(key, B, L1, L2, orbit, P, E, **tiles):
    k_param, k_x = jax.random.split(key)
    param = jax.random.normal(k_param, (L1, L2, orbit, P, E), dtype=jnp.float32)
    x = jax.random.randint(k_x, (B, L1, L2, orbit), 0, P, dtype=jnp.int32)
    packed = pack_embedding_param(param)                # init-time, outside hot path
    out = jax.block_until_ready(embedding_forward(x, packed, **tiles))
    ref = _reference(x, param)
    assert out.shape == (B, L1 * L2 * orbit, E), out.shape
    assert jnp.allclose(out, ref, atol=1e-6), "mismatch vs reference"


if __name__ == "__main__":
    key = jax.random.PRNGKey(0)
    k1, k2, k3, k4, k5 = jax.random.split(key, 5)

    # Primary small config (matches the module's toy shapes); E=32 -> 4 sites per row.
    _run_case(k1, B=2, L1=2, L2=2, orbit=2, P=4, E=32)
    # Multi-site-block grid with batch innermost (param residency across batch steps).
    _run_case(k2, B=2, L1=8, L2=8, orbit=2, P=2, E=32, site_tile=8, batch_tile=1)
    # N not a multiple of 8*g -> site-padding path (padded rows sliced off).
    _run_case(k3, B=2, L1=3, L2=1, orbit=3, P=2, E=32)
    # E = 128 -> no packing (g = 1) path.
    _run_case(k4, B=2, L1=2, L2=2, orbit=2, P=3, E=128)
    # E not dividing 128 -> partial packing (g = 2, 96-lane rows) path.
    _run_case(k5, B=2, L1=2, L2=2, orbit=1, P=3, E=48)

    print("KERNEL_OK")
</pallas_src>

<mosaic_0001>
module attributes {stable_mosaic.version = 11 : i64} {
  func.func @_embedding_kernel(%arg0: i32, %arg1: i32, %arg2: memref<4x2x8x1xi32, #tpu.memory_space<vmem>>, %arg3: memref<4x8x128xf32, #tpu.memory_space<vmem>>, %arg4: memref<2x8x128xf32, #tpu.memory_space<vmem>>) attributes {dimension_semantics = [#tpu.dimension_semantics<arbitrary>, #tpu.dimension_semantics<arbitrary>], iteration_bounds = array<i64: 1, 1>, scalar_prefetch = 0 : i64, scratch_operands = 0 : i64, tpu.core_type = #tpu.core_type<tc>, window_params = [{transform_indices = @transform_0, window_bounds = array<i64: 4, 2, 8, 1>}, {transform_indices = @transform_1, window_bounds = array<i64: 4, 8, 128>}, {transform_indices = @transform_2, window_bounds = array<i64: 2, 8, 128>}]} {
    %0 = tpu.iota {dimensions = array<i32: 2>} : vector<2x8x128xi32>
    %c0_i32 = arith.constant 0 : i32
    %1 = vector.broadcast %c0_i32 : i32 to vector<2x8x128xi32>
    %c0_i32_0 = arith.constant 0 : i32
    %2 = vector.broadcast %c0_i32_0 : i32 to vector<2x8x128xi32>
    %3 = arith.cmpi sge, %0, %2 : vector<2x8x128xi32>
    %c32_i32 = arith.constant 32 : i32
    %4 = vector.broadcast %c32_i32 : i32 to vector<2x8x128xi32>
    %5 = arith.cmpi slt, %0, %4 : vector<2x8x128xi32>
    %6 = arith.andi %3, %5 : vector<2x8x128xi1>
    %c0 = arith.constant 0 : index
    %c0_1 = arith.constant 0 : index
    %c0_2 = arith.constant 0 : index
    %c0_3 = arith.constant 0 : index
    %7 = vector.load %arg2[%c0, %c0_1, %c0_2, %c0_3] : memref<4x2x8x1xi32, #tpu.memory_space<vmem>>, vector<1x2x8x1xi32>
    %8 = vector.shape_cast %7 : vector<1x2x8x1xi32> to vector<2x8x1xi32>
    %9 = vector.shape_cast %8 : vector<2x8x1xi32> to vector<2x8x1xi32>
    %10 = vector.broadcast %9 : vector<2x8x1xi32> to vector<2x8x128xi32>
    %11 = arith.select %6, %10, %1 : vector<2x8x128xi1>, vector<2x8x128xi32>
    %c32_i32_4 = arith.constant 32 : i32
    %12 = vector.broadcast %c32_i32_4 : i32 to vector<2x8x128xi32>
    %13 = arith.cmpi sge, %0, %12 : vector<2x8x128xi32>
    %c64_i32 = arith.constant 64 : i32
    %14 = vector.broadcast %c64_i32 : i32 to vector<2x8x128xi32>
    %15 = arith.cmpi slt, %0, %14 : vector<2x8x128xi32>
    %16 = arith.andi %13, %15 : vector<2x8x128xi1>
    %c1 = arith.constant 1 : index
    %c0_5 = arith.constant 0 : index
    %c0_6 = arith.constant 0 : index
    %c0_7 = arith.constant 0 : index
    %17 = vector.load %arg2[%c1, %c0_5, %c0_6, %c0_7] : memref<4x2x8x1xi32, #tpu.memory_space<vmem>>, vector<1x2x8x1xi32>
    %18 = vector.shape_cast %17 : vector<1x2x8x1xi32> to vector<2x8x1xi32>
    %19 = vector.shape_cast %18 : vector<2x8x1xi32> to vector<2x8x1xi32>
    %20 = vector.broadcast %19 : vector<2x8x1xi32> to vector<2x8x128xi32>
    %21 = arith.select %16, %20, %11 : vector<2x8x128xi1>, vector<2x8x128xi32>
    %c64_i32_8 = arith.constant 64 : i32
    %22 = vector.broadcast %c64_i32_8 : i32 to vector<2x8x128xi32>
    %23 = arith.cmpi sge, %0, %22 : vector<2x8x128xi32>
    %c96_i32 = arith.constant 96 : i32
    %24 = vector.broadcast %c96_i32 : i32 to vector<2x8x128xi32>
    %25 = arith.cmpi slt, %0, %24 : vector<2x8x128xi32>
    %26 = arith.andi %23, %25 : vector<2x8x128xi1>
    %c2 = arith.constant 2 : index
    %c0_9 = arith.constant 0 : index
    %c0_10 = arith.constant 0 : index
    %c0_11 = arith.constant 0 : index
    %27 = vector.load %arg2[%c2, %c0_9, %c0_10, %c0_11] : memref<4x2x8x1xi32, #tpu.memory_space<vmem>>, vector<1x2x8x1xi32>
    %28 = vector.shape_cast %27 : vector<1x2x8x1xi32> to vector<2x8x1xi32>
    %29 = vector.shape_cast %28 : vector<2x8x1xi32> to vector<2x8x1xi32>
    %30 = vector.broadcast %29 : vector<2x8x1xi32> to vector<2x8x128xi32>
    %31 = arith.select %26, %30, %21 : vector<2x8x128xi1>, vector<2x8x128xi32>
    %c96_i32_12 = arith.constant 96 : i32
    %32 = vector.broadcast %c96_i32_12 : i32 to vector<2x8x128xi32>
    %33 = arith.cmpi sge, %0, %32 : vector<2x8x128xi32>
    %c128_i32 = arith.constant 128 : i32
    %34 = vector.broadcast %c128_i32 : i32 to vector<2x8x128xi32>
    %35 = arith.cmpi slt, %0, %34 : vector<2x8x128xi32>
    %36 = arith.andi %33, %35 : vector<2x8x128xi1>
    %c3 = arith.constant 3 : index
    %c0_13 = arith.constant 0 : index
    %c0_14 = arith.constant 0 : index
    %c0_15 = arith.constant 0 : index
    %37 = vector.load %arg2[%c3, %c0_13, %c0_14, %c0_15] : memref<4x2x8x1xi32, #tpu.memory_space<vmem>>, vector<1x2x8x1xi32>
    %38 = vector.shape_cast %37 : vector<1x2x8x1xi32> to vector<2x8x1xi32>
    %39 = vector.shape_cast %38 : vector<2x8x1xi32> to vector<2x8x1xi32>
    %40 = vector.broadcast %39 : vector<2x8x1xi32> to vector<2x8x128xi32>
    %41 = arith.select %36, %40, %31 : vector<2x8x128xi1>, vector<2x8x128xi32>
    %cst = arith.constant 0.000000e+00 : f32
    %42 = vector.broadcast %cst : f32 to vector<2x8x128xf32>
    %c0_i32_16 = arith.constant 0 : i32
    %43 = vector.broadcast %c0_i32_16 : i32 to vector<2x8x128xi32>
    %44 = arith.cmpi eq, %41, %43 : vector<2x8x128xi32>
    %c0_17 = arith.constant 0 : index
    %c0_18 = arith.constant 0 : index
    %c0_19 = arith.constant 0 : index
    %45 = vector.load %arg3[%c0_17, %c0_18, %c0_19] : memref<4x8x128xf32, #tpu.memory_space<vmem>>, vector<1x8x128xf32>
    %46 = vector.shape_cast %45 : vector<1x8x128xf32> to vector<8x128xf32>
    %47 = vector.shape_cast %46 : vector<8x128xf32> to vector<1x8x128xf32>
    %48 = vector.shape_cast %47 : vector<1x8x128xf32> to vector<1x8x128xf32>
    %49 = vector.broadcast %48 : vector<1x8x128xf32> to vector<2x8x128xf32>
    %50 = arith.select %44, %49, %42 : vector<2x8x128xi1>, vector<2x8x128xf32>
    %c1_i32 = arith.constant 1 : i32
    %51 = vector.broadcast %c1_i32 : i32 to vector<2x8x128xi32>
    %52 = arith.cmpi eq, %41, %51 : vector<2x8x128xi32>
    %c1_20 = arith.constant 1 : index
    %c0_21 = arith.constant 0 : index
    %c0_22 = arith.constant 0 : index
    %53 = vector.load %arg3[%c1_20, %c0_21, %c0_22] : memref<4x8x128xf32, #tpu.memory_space<vmem>>, vector<1x8x128xf32>
    %54 = vector.shape_cast %53 : vector<1x8x128xf32> to vector<8x128xf32>
    %55 = vector.shape_cast %54 : vector<8x128xf32> to vector<1x8x128xf32>
    %56 = vector.shape_cast %55 : vector<1x8x128xf32> to vector<1x8x128xf32>
    %57 = vector.broadcast %56 : vector<1x8x128xf32> to vector<2x8x128xf32>
    %58 = arith.select %52, %57, %50 : vector<2x8x128xi1>, vector<2x8x128xf32>
    %c2_i32 = arith.constant 2 : i32
    %59 = vector.broadcast %c2_i32 : i32 to vector<2x8x128xi32>
    %60 = arith.cmpi eq, %41, %59 : vector<2x8x128xi32>
    %c2_23 = arith.constant 2 : index
    %c0_24 = arith.constant 0 : index
    %c0_25 = arith.constant 0 : index
    %61 = vector.load %arg3[%c2_23, %c0_24, %c0_25] : memref<4x8x128xf32, #tpu.memory_space<vmem>>, vector<1x8x128xf32>
    %62 = vector.shape_cast %61 : vector<1x8x128xf32> to vector<8x128xf32>
    %63 = vector.shape_cast %62 : vector<8x128xf32> to vector<1x8x128xf32>
    %64 = vector.shape_cast %63 : vector<1x8x128xf32> to vector<1x8x128xf32>
    %65 = vector.broadcast %64 : vector<1x8x128xf32> to vector<2x8x128xf32>
    %66 = arith.select %60, %65, %58 : vector<2x8x128xi1>, vector<2x8x128xf32>
    %c3_i32 = arith.constant 3 : i32
    %67 = vector.broadcast %c3_i32 : i32 to vector<2x8x128xi32>
    %68 = arith.cmpi eq, %41, %67 : vector<2x8x128xi32>
    %c3_26 = arith.constant 3 : index
    %c0_27 = arith.constant 0 : index
    %c0_28 = arith.constant 0 : index
    %69 = vector.load %arg3[%c3_26, %c0_27, %c0_28] : memref<4x8x128xf32, #tpu.memory_space<vmem>>, vector<1x8x128xf32>
    %70 = vector.shape_cast %69 : vector<1x8x128xf32> to vector<8x128xf32>
    %71 = vector.shape_cast %70 : vector<8x128xf32> to vector<1x8x128xf32>
    %72 = vector.shape_cast %71 : vector<1x8x128xf32> to vector<1x8x128xf32>
    %73 = vector.broadcast %72 : vector<1x8x128xf32> to vector<2x8x128xf32>
    %74 = arith.select %68, %73, %66 : vector<2x8x128xi1>, vector<2x8x128xf32>
    %c0_29 = arith.constant 0 : index
    %c0_30 = arith.constant 0 : index
    %c0_31 = arith.constant 0 : index
    %75 = vector.load %arg4[%c0_29, %c0_30, %c0_31] : memref<2x8x128xf32, #tpu.memory_space<vmem>>, vector<2x8x128xf32>
    tpu.vector_store %arg4[%c0_29, %c0_30, %c0_31], %74 {strides = array<i32>} : memref<2x8x128xf32, #tpu.memory_space<vmem>>, vector<2x8x128xf32>,
    return
  }
  func.func @transform_0(%arg0: i32, %arg1: i32) -> (i32, i32, i32, i32) {
    %c0_i32 = arith.constant 0 : i32
    %c0_i32_0 = arith.constant 0 : i32
    %c0_i32_1 = arith.constant 0 : i32
    return %c0_i32, %arg1, %arg0, %c0_i32_0 : i32, i32, i32, i32
  }
  func.func @transform_1(%arg0: i32, %arg1: i32) -> (i32, i32, i32) {
    %c0_i32 = arith.constant 0 : i32
    %c0_i32_0 = arith.constant 0 : i32
    %c0_i32_1 = arith.constant 0 : i32
    return %c0_i32, %arg0, %c0_i32_0 : i32, i32, i32
  }
  func.func @transform_2(%arg0: i32, %arg1: i32) -> (i32, i32, i32) {
    %c0_i32 = arith.constant 0 : i32
    %c0_i32_0 = arith.constant 0 : i32
    return %arg1, %arg0, %c0_i32 : i32, i32, i32
  }
}

</mosaic_0001>

<bundles_post_ra>
// kernel: tpu_custom_call.1
= control target key start
LH: loop header
LB: loop body
LE: loop exit
PB: predicated region body
PF: predicated region fallthrough
CT: control target
= control target key end

     0   :  { %v149_v2 = vmov 0   ;;  %s216_s0 = inlined_call_operand.vmem [shape: s32[4,2,8,1], index: 0, kind: input, shape index: {}]   ;;  %s217_s1 = inlined_call_operand.vmem [shape: f32[4,8,128], index: 1, kind: input, shape index: {}]   ;;  %s218_s2 = inlined_call_operand.hbm [shape: f32[2,8,128], index: 2, kind: output, shape index: {}]  }
   0x1   :  { %v110_v0 = vld [vmem:[%s216_s0 + $0x10] sm:$0xff]  ;;  %v17_v1 = vld [vmem:[%s216_s0] sm:$0xff]  ;;  %124 = vset.pattern.permute.xlu1 %v149_v2  ;;  %123 = vset.pattern.permute.xlu0 %v149_v2 }
   0x2   :  { %34 = vperm.xlu1 %124, %v110_v0   ;;  %20 = vperm.xlu0 %123, %v17_v1  }
   0x3   :  { %7 = vsyncpa [#allocation3], 0  ;;  %v111_v3 = vld [vmem:[%s216_s0 + $0x18] sm:$0xff]  ;;  %v18_v4 = vld [vmem:[%s216_s0 + $0x8] sm:$0xff]  ;;  %v12_v9 = vlaneseq  ;;  %s150_s4 = smov [#allocation2]  }
   0x4   :  { %v113_v5 = vld [vmem:[%s216_s0 + $0x28] sm:$0xff]  ;;  %v112_v6 = vld [vmem:[%s216_s0 + $0x20] sm:$0xff]  ;;  %v115_v7 = vld [vmem:[%s216_s0 + $0x38] sm:$0xff]  ;;  %s99_s5 = sshll.u32 %s150_s4, 4  ;;  %s100_s5 = int_to_ptr.vmem [resolvable:$true] %s99_s5 }
   0x5   :  { %v114_v8 = vld [vmem:[%s216_s0 + $0x30] sm:$0xff]  ;;  %v13_v12 = vand.u32 127, %v12_v9  ;;  %v71_v23 = vld [vmem:[%s217_s1] sm:$0xff]  ;;  %v116_v26 = vld [vmem:[%s217_s1 + $0x8] sm:$0xff]  ;;  %p130_p1 = scmp.lt.s32.totalorder %s100_s5, %s100_s5 }
   0x6   :  { %37 = vperm.xlu1 %124, %v111_v3   ;;  %23 = vperm.xlu0 %123, %v18_v4   ;;  %v117_v29 = vld [vmem:[%s217_s1 + $0x10] sm:$0xff]  ;;  %v118_v30 = vld [vmem:[%s217_s1 + $0x18] sm:$0xff]  ;;  %s125_s1 = scalar_lea.vmem %s100_s5, 256 }
   0x7   :  { %vm15_vm0 = vcmp.lt.s32.totalorder %v13_v12, 32  ;;  %vm27_vm1 = vcmp.ge.s32.totalorder %v13_v12, 32  ;;  %vm28_vm2 = vcmp.lt.s32.totalorder %v13_v12, 64  ;;  %vm41_vm3 = vcmp.ge.s32.totalorder %v13_v12, 64  ;;  %p126_p0 = scmp.ne.s32.totalorder %s100_s5, %s125_s1  ;;  %p131_p2 = scmp.lt.s32.totalorder %s125_s1, %s125_s1 }
   0x8   :  { %vm42_vm4 = vcmp.lt.s32.totalorder %v13_v12, 96  ;;  %vm29_vm5 = vmand %vm27_vm1, %vm28_vm2  ;;  %vm55_vm7 = vcmp.ge.s32.totalorder %v13_v12, 96 }
   0x9   :  { %vm43_vm6 = vmand %vm41_vm3, %vm42_vm4  ;;  %p132_p3 = por %p131_p2, %p130_p1 }
   0xa   :  { %51 = vperm.xlu1 %124, %v113_v5   ;;  %48 = vperm.xlu0 %123, %v112_v6  }
   0xb   :  { %p133_p4 = pnand %p132_p3, %p126_p0 }
   0xe   :  { %65 = vperm.xlu1 %124, %v115_v7   ;;  %62 = vperm.xlu0 %123, %v114_v8  }
  0x81   :  { %v35_v10 = vpop.permute.xlu1 %34  ;;  %v21_v11 = vpop.permute.xlu0 %20 }
  0x82   :  { %v25_v15 = vsel %vm15_vm0, %v21_v11, 0 }
  0x83   :  { %v39_v19 = vsel %vm29_vm5, %v35_v10, %v25_v15 }
  0x85   :  { %v38_v13 = vpop.permute.xlu1 %37  ;;  %v24_v14 = vpop.permute.xlu0 %23 }
  0x86   :  { %v26_v16 = vsel %vm15_vm0, %v24_v14, 0 }
  0x87   :  { %v40_v20 = vsel %vm29_vm5, %v38_v13, %v26_v16 }
  0x89   :  { %v52_v17 = vpop.permute.xlu1 %51  ;;  %v49_v18 = vpop.permute.xlu0 %48 }
  0x8a   :  { %v54_v21 = vsel %vm43_vm6, %v52_v17, %v40_v20  ;;  %v53_v22 = vsel %vm43_vm6, %v49_v18, %v39_v19 }
  0x8d   :  { %v66_v24 = vpop.permute.xlu1 %65  ;;  %v63_v25 = vpop.permute.xlu0 %62 }
  0x8e   :  { %v68_v27 = vsel %vm55_vm7, %v66_v24, %v54_v21  ;;  %v67_v28 = vsel %vm55_vm7, %v63_v25, %v53_v22 }
  0x8f   :  { %vm70_vm8 = vcmp.eq.s32.totalorder %v68_v27, 0  ;;  %vm75_vm9 = vcmp.eq.s32.totalorder %v68_v27, 1  ;;  %vm69_vm10 = vcmp.eq.s32.totalorder %v67_v28, 0  ;;  %vm74_vm11 = vcmp.eq.s32.totalorder %v67_v28, 1 }
  0x90   :  { %v73_v31 = vsel %vm70_vm8, %v71_v23, 0.0  ;;  %vm81_vm12 = vcmp.eq.s32.totalorder %v68_v27, 2  ;;  %v72_v33 = vsel %vm69_vm10, %v71_v23, 0.0  ;;  %vm87_vm13 = vcmp.eq.s32.totalorder %v68_v27, 3 }
  0x91   :  { %v79_v32 = vsel %vm75_vm9, %v116_v26, %v73_v31  ;;  %v78_v35 = vsel %vm74_vm11, %v116_v26, %v72_v33  ;;  %vm80_vm14 = vcmp.eq.s32.totalorder %v67_v28, 2  ;;  %vm86_vm15 = vcmp.eq.s32.totalorder %v67_v28, 3 }
  0x92   :  { %v85_v34 = vsel %vm81_vm12, %v117_v29, %v79_v32  ;;  %v84_v37 = vsel %vm80_vm14, %v117_v29, %v78_v35 }
  0x93   :  { %v91_v36 = vsel %vm87_vm13, %v118_v30, %v85_v34  ;;  %v90_v38 = vsel %vm86_vm15, %v118_v30, %v84_v37 }
  0x94   :  { %93 = vst [vmem:[#allocation2 + $0x8] sm:$0xff] %v91_v36  ;;  %92 = vst [vmem:[#allocation2] sm:$0xff] %v90_v38 }
  0x95   :  { %136 = shalt.err (!%p133_p4)
}
  0x96   :  { %s137_s8 = scalar_lea.hbm %s218_s2, 256 }
  0x97   :  { %p138_p5 = scmp.ne.s32.totalorder %s218_s2, %s137_s8  ;;  %p141_p6 = scmp.lt.u32.totalorder %s137_s8, %s218_s2 }
  0x99   :  { %p143_p7 = pnand %p141_p6, %p138_p5 }
  0x9b   :  { %146 = shalt.err (!%p143_p7)
}
  0x9c   :  { %s151_s13 = smov 128   ;;  %s152_s14 = smov 8  }
  0x9d   :  { %105 = dma.vmem_to_hbm [thread:$0]  %s100_s5, 256, %s218_s2, [#allocation3], %s151_s13, %s151_s13, %s152_s14  }
  0x9e   :  { %147 = dma.done.wait [#allocation3], 256  }
  0x9f   :  { %148 = vsyncadd [#allocation3], 4294967040 }
  0xa0   :  { %109 = vsyncpa [#allocation3], 1 }

</bundles_post_ra>
